<compile_context>
chip_gen: v6e
topology: v6e:2x2x1
jax: 0.10.0
libtpu: 0.0.40
codegen_flags: <defaults>
</compile_context>

<pallas_src>
import jax
import jax.numpy as jnp
from jax.experimental import pallas as pl
from jax.experimental.pallas import tpu as pltpu


_X_TILE_BYTES = 2 << 20    # ~2 MiB of x per grid step (per review: 1-4 MiB)
_W1_TILE_BYTES = 4 << 20   # ~4 MiB of bf16 w1 per hidden tile


def _round_up(n, m):
    return ((n + m - 1) // m) * m


def _hidden_tile(d, h):
    """Hidden-dim tile: byte-budgeted, multiple of 128, capped at 2048."""
    t = _W1_TILE_BYTES // (max(d, 1) * 2)          # bf16 columns per w1 tile
    t = max(128, min((t // 128) * 128, 2048))
    return h if h <= t else t


def _batch_tile(b, d, itemsize):
    """Batch tile: byte-budgeted, multiple of 256, >=2 grid steps when large."""
    if b <= 256:
        return b                                    # single full block
    tb = _X_TILE_BYTES // max(d * itemsize, 1)
    tb = max(256, min(tb, b))
    # keep at least 2 grid steps so v7x's second TensorCore gets work
    tb = min(tb, _round_up(pl.cdiv(b, 2), 256))
    return max(256, (tb // 256) * 256)


def _mlp_kernel(x_ref, w1_ref, b1_ref, w2_ref, b2_ref, o_ref, acc_ref):
    """Fused 2-layer MLP over one (batch-tile, hidden-tile) grid cell.

    x_ref : (TB, D)   native dtype (streamed per batch tile, resident over j)
    w1_ref: (D, TH)   bf16   (streamed per hidden tile)
    b1_ref: (1, TH)   f32
    w2_ref: (1, TH)   f32    (row form of the (H, 1) output weight)
    b2_ref: (1, 1)    f32    (SMEM scalar)
    o_ref : (TB, 1)   f32    (resident across the hidden axis)
    acc_ref:(TB, 1)   f32    VMEM scratch, exact layer-2 partial sum
    """
    j = pl.program_id(1)

    @pl.when(j == 0)
    def _():
        acc_ref[...] = jnp.zeros_like(acc_ref)

    # Layer 1 (this hidden slice): bf16 MXU matmul with f32 accumulation.
    # The x cast to bf16 happens here (VPU), not in the wrapper.
    x = x_ref[...].astype(jnp.bfloat16)
    h = jnp.dot(x, w1_ref[...], preferred_element_type=jnp.float32)
    h = jax.nn.sigmoid(h + b1_ref[...])             # f32, EUP exp

    # Layer 2 partial sum over this hidden slice: output width is 1, so use a
    # VPU multiply against the broadcast weight row + XLU lane reduction
    # instead of an N=1 MXU matmul.  Exact (pure sum over H) f32 accumulation.
    acc_ref[...] += jnp.sum(h * w2_ref[...], axis=-1, keepdims=True)

    @pl.when(j == pl.num_programs(1) - 1)
    def _():
        y = acc_ref[...] + b2_ref[0, 0]
        o_ref[...] = jax.nn.sigmoid(y).astype(o_ref.dtype)


def prepare_params(w1, b1, w2, b2):
    """One-time parameter preprocessing (PyTorch layout -> kernel layout).

    w1: (H, D), b1: (H,), w2: (1, H), b2: (1,)  with H = 2*D.
    Returns (w1_t bf16 (D,Hp), b1_row f32 (1,Hp), w2_row f32 (1,Hp), b2 (1,1))
    where Hp is H zero-padded to a multiple of the hidden tile (exact: the
    padded columns contribute sigmoid(0) * 0 == 0 to the layer-2 sum).
    """
    h_dim, d = w1.shape
    assert b1.shape == (h_dim,) and w2.shape == (1, h_dim) and b2.shape == (1,)

    th = _hidden_tile(d, h_dim)
    h_pad = _round_up(h_dim, th)

    w1_t = jnp.asarray(w1, jnp.float32).T.astype(jnp.bfloat16)      # (D, H)
    b1_row = jnp.asarray(b1, jnp.float32).reshape(1, h_dim)
    w2_row = jnp.asarray(w2, jnp.float32).reshape(1, h_dim)
    if h_pad != h_dim:
        w1_t = jnp.pad(w1_t, ((0, 0), (0, h_pad - h_dim)))
        b1_row = jnp.pad(b1_row, ((0, 0), (0, h_pad - h_dim)))
        w2_row = jnp.pad(w2_row, ((0, 0), (0, h_pad - h_dim)))
    b2_s = jnp.asarray(b2, jnp.float32).reshape(1, 1)
    return w1_t, b1_row, w2_row, b2_s


def classification_forward(x, params):
    """x: (B, D) float; params from prepare_params(). Returns (B, 1) f32."""
    w1_t, b1_row, w2_row, b2_s = params
    b_dim, d = x.shape
    h_pad = w1_t.shape[1]
    assert w1_t.shape == (d, h_pad)
    assert b1_row.shape == (1, h_pad) and w2_row.shape == (1, h_pad)
    assert b2_s.shape == (1, 1)

    itemsize = jnp.dtype(x.dtype).itemsize
    tb = _batch_tile(b_dim, d, itemsize)
    th = _hidden_tile(d, h_pad)          # consistent with prepare_params padding
    assert h_pad % th == 0
    num_b = pl.cdiv(b_dim, tb)           # last block may be partial (masked)
    num_h = h_pad // th

    # Explicit, footprint-derived scoped-VMEM budget (clamped to be legal on
    # every generation, incl. v7x's 64 MiB physical VMEM).
    est_vmem = (
        2 * tb * d * itemsize            # x tiles, double-buffered
        + 2 * d * th * 2                 # w1 tiles (bf16), double-buffered
        + 2 * 2 * 8 * th * 4             # b1 / w2 rows (sublane-padded)
        + 2 * tb * 4                     # output tiles
        + tb * 4                         # accumulator scratch
        + tb * th * 4                    # layer-1 intermediate headroom
    )
    vmem_limit = int(min(max(2 * est_vmem, 32 << 20), 48 << 20))

    out = pl.pallas_call(
        _mlp_kernel,
        out_shape=jax.ShapeDtypeStruct((b_dim, 1), jnp.float32),
        grid=(num_b, num_h),
        in_specs=[
            pl.BlockSpec((tb, d), lambda i, j: (i, 0)),       # x: per batch tile
            pl.BlockSpec((d, th), lambda i, j: (0, j)),       # w1: per hidden tile
            pl.BlockSpec((1, th), lambda i, j: (0, j)),       # b1
            pl.BlockSpec((1, th), lambda i, j: (0, j)),       # w2 row
            pl.BlockSpec(memory_space=pltpu.MemorySpace.SMEM),  # b2 scalar
        ],
        out_specs=pl.BlockSpec((tb, 1), lambda i, j: (i, 0)),  # resident over j
        scratch_shapes=[pltpu.VMEM((tb, 1), jnp.float32)],
        compiler_params=pltpu.CompilerParams(
            dimension_semantics=("parallel", "arbitrary"),
            vmem_limit_bytes=vmem_limit),
    )(x, w1_t, b1_row, w2_row, b2_s)

    return out


def init_params(key, input_dim):
    """Match PyTorch nn.Linear default init shapes / distributions:
    uniform(-1/sqrt(fan_in), 1/sqrt(fan_in)) for weights and biases."""
    hidden = 2 * input_dim
    k1, k2, k3, k4 = jax.random.split(key, 4)

    bound1 = 1.0 / jnp.sqrt(jnp.float32(input_dim))
    w1 = jax.random.uniform(k1, (hidden, input_dim), jnp.float32, -bound1, bound1)
    b1 = jax.random.uniform(k2, (hidden,), jnp.float32, -bound1, bound1)

    bound2 = 1.0 / jnp.sqrt(jnp.float32(hidden))
    w2 = jax.random.uniform(k3, (1, hidden), jnp.float32, -bound2, bound2)
    b2 = jax.random.uniform(k4, (1,), jnp.float32, -bound2, bound2)
    return w1, b1, w2, b2


if __name__ == "__main__":
    key = jax.random.PRNGKey(0)
    k_x, k_p = jax.random.split(key)

    batch = 8
    input_dim = 16          # stand-in for "train_data.shape[1]"

    x = jax.random.normal(k_x, (batch, input_dim), jnp.float32)
    w1, b1, w2, b2 = init_params(k_p, input_dim)

    params = prepare_params(w1, b1, w2, b2)   # one-time layout/cast/pad, hoisted
    y = classification_forward(x, params)
    y = jax.block_until_ready(y)

    # Pure-JAX f32 reference of the same forward math (PyTorch semantics).
    h_ref = jax.nn.sigmoid(x @ w1.T + b1)
    y_ref = jax.nn.sigmoid(h_ref @ w2.T + b2)

    assert y.shape == (batch, 1)
    # bf16 MXU inputs (f32 accumulation) -> loosened tolerance vs pure-f32 ref.
    assert jnp.allclose(y, y_ref, atol=1e-2, rtol=1e-2), (
        f"max abs err {jnp.max(jnp.abs(y - y_ref))}")

    print("KERNEL_OK")
</pallas_src>

<mosaic_0001>
module attributes {stable_mosaic.version = 11 : i64} {
  func.func @_mlp_kernel(%arg0: i32, %arg1: i32, %arg2: memref<8x16xf32, #tpu.memory_space<vmem>>, %arg3: memref<16x32xbf16, #tpu.memory_space<vmem>>, %arg4: memref<1x32xf32, #tpu.memory_space<vmem>>, %arg5: memref<1x32xf32, #tpu.memory_space<vmem>>, %arg6: memref<1x1xf32, #tpu.memory_space<smem>>, %arg7: memref<8x1xf32, #tpu.memory_space<vmem>>, %arg8: memref<8x1xf32, #tpu.memory_space<vmem>>) attributes {dimension_semantics = [#tpu.dimension_semantics<parallel>, #tpu.dimension_semantics<arbitrary>], iteration_bounds = array<i64: 1, 1>, scalar_prefetch = 0 : i64, scratch_operands = 1 : i64, tpu.core_type = #tpu.core_type<tc>, window_params = [{transform_indices = @transform_0, window_bounds = array<i64: 8, 16>}, {transform_indices = @transform_1, window_bounds = array<i64: 16, 32>}, {transform_indices = @transform_2, window_bounds = array<i64: 1, 32>}, {transform_indices = @transform_3, window_bounds = array<i64: 1, 32>}, {transform_indices = @transform_4, window_bounds = array<i64: 1, 1>}, {transform_indices = @transform_5, window_bounds = array<i64: 8, 1>}]} {
    %c0_i32 = arith.constant 0 : i32
    %0 = arith.cmpi eq, %arg1, %c0_i32 : i32
    %1 = arith.extui %0 : i1 to i32
    %c0_i32_0 = arith.constant 0 : i32
    %2 = arith.cmpi ne, %1, %c0_i32_0 : i32
    scf.if %2 {
      %cst_16 = arith.constant 0.000000e+00 : f32
      %26 = vector.broadcast %cst_16 : f32 to vector<8x1xf32>
      %c0_17 = arith.constant 0 : index
      %c0_18 = arith.constant 0 : index
      %27 = vector.load %arg8[%c0_17, %c0_18] : memref<8x1xf32, #tpu.memory_space<vmem>>, vector<8x1xf32>
      tpu.vector_store %arg8[%c0_17, %c0_18], %26 {strides = array<i32>} : memref<8x1xf32, #tpu.memory_space<vmem>>, vector<8x1xf32>,
    } else {
    }
    %c0 = arith.constant 0 : index
    %c0_1 = arith.constant 0 : index
    %3 = vector.load %arg2[%c0, %c0_1] : memref<8x16xf32, #tpu.memory_space<vmem>>, vector<8x16xf32>
    %4 = arith.truncf %3 : vector<8x16xf32> to vector<8x16xbf16>
    %c0_2 = arith.constant 0 : index
    %c0_3 = arith.constant 0 : index
    %5 = vector.load %arg3[%c0_2, %c0_3] : memref<16x32xbf16, #tpu.memory_space<vmem>>, vector<16x32xbf16>
    %cst = arith.constant dense<0.000000e+00> : vector<8x32xf32>
    %6 = tpu.matmul %4, %5, %cst {dimension_numbers = #tpu.dot_dimension_numbers<[1], [0], [0], [1], [0, 0, 1, 1], [], []>} : vector<8x16xbf16>, vector<16x32xbf16>, vector<8x32xf32> -> vector<8x32xf32>
    %c0_4 = arith.constant 0 : index
    %c0_5 = arith.constant 0 : index
    %7 = vector.load %arg4[%c0_4, %c0_5] : memref<1x32xf32, #tpu.memory_space<vmem>>, vector<1x32xf32>
    %8 = vector.broadcast %7 : vector<1x32xf32> to vector<8x32xf32>
    %9 = arith.addf %6, %8 : vector<8x32xf32>
    %10 = arith.negf %9 : vector<8x32xf32>
    %11 = math.exp %10 : vector<8x32xf32>
    %cst_6 = arith.constant 1.000000e+00 : f32
    %12 = vector.broadcast %cst_6 : f32 to vector<8x32xf32>
    %13 = arith.addf %12, %11 : vector<8x32xf32>
    %14 = arith.divf %12, %13 : vector<8x32xf32>
    %c0_7 = arith.constant 0 : index
    %c0_8 = arith.constant 0 : index
    %15 = vector.load %arg8[%c0_7, %c0_8] : memref<8x1xf32, #tpu.memory_space<vmem>>, vector<8x1xf32>
    %c0_9 = arith.constant 0 : index
    %c0_10 = arith.constant 0 : index
    %16 = vector.load %arg5[%c0_9, %c0_10] : memref<1x32xf32, #tpu.memory_space<vmem>>, vector<1x32xf32>
    %17 = vector.broadcast %16 : vector<1x32xf32> to vector<8x32xf32>
    %18 = arith.mulf %14, %17 : vector<8x32xf32>
    %cst_11 = arith.constant dense<0.000000e+00> : vector<8xf32>
    %19 = vector.multi_reduction <add>, %18, %cst_11 [1] : vector<8x32xf32> to vector<8xf32>
    %20 = vector.shape_cast %19 : vector<8xf32> to vector<8x1xf32>
    %21 = arith.addf %15, %20 : vector<8x1xf32>
    %c0_12 = arith.constant 0 : index
    %c0_13 = arith.constant 0 : index
    %22 = vector.load %arg8[%c0_12, %c0_13] : memref<8x1xf32, #tpu.memory_space<vmem>>, vector<8x1xf32>
    tpu.vector_store %arg8[%c0_12, %c0_13], %21 {strides = array<i32>} : memref<8x1xf32, #tpu.memory_space<vmem>>, vector<8x1xf32>,
    %c0_i32_14 = arith.constant 0 : i32
    %23 = arith.cmpi eq, %arg1, %c0_i32_14 : i32
    %24 = arith.extui %23 : i1 to i32
    %c0_i32_15 = arith.constant 0 : i32
    %25 = arith.cmpi ne, %24, %c0_i32_15 : i32
    scf.if %25 {
      %c0_16 = arith.constant 0 : index
      %c0_17 = arith.constant 0 : index
      %26 = vector.load %arg8[%c0_16, %c0_17] : memref<8x1xf32, #tpu.memory_space<vmem>>, vector<8x1xf32>
      %c0_18 = arith.constant 0 : index
      %c0_19 = arith.constant 0 : index
      %27 = memref.load %arg6[%c0_18, %c0_19] : memref<1x1xf32, #tpu.memory_space<smem>>
      %28 = vector.broadcast %27 : f32 to vector<8x1xf32>
      %29 = arith.addf %26, %28 : vector<8x1xf32>
      %30 = arith.negf %29 : vector<8x1xf32>
      %31 = math.exp %30 : vector<8x1xf32>
      %cst_20 = arith.constant 1.000000e+00 : f32
      %32 = vector.broadcast %cst_20 : f32 to vector<8x1xf32>
      %33 = arith.addf %32, %31 : vector<8x1xf32>
      %34 = arith.divf %32, %33 : vector<8x1xf32>
      %c0_21 = arith.constant 0 : index
      %c0_22 = arith.constant 0 : index
      %35 = vector.load %arg7[%c0_21, %c0_22] : memref<8x1xf32, #tpu.memory_space<vmem>>, vector<8x1xf32>
      tpu.vector_store %arg7[%c0_21, %c0_22], %34 {strides = array<i32>} : memref<8x1xf32, #tpu.memory_space<vmem>>, vector<8x1xf32>,
    } else {
    }
    return
  }
  func.func @transform_0(%arg0: i32, %arg1: i32) -> (i32, i32) {
    %c0_i32 = arith.constant 0 : i32
    %c0_i32_0 = arith.constant 0 : i32
    return %arg0, %c0_i32 : i32, i32
  }
  func.func @transform_1(%arg0: i32, %arg1: i32) -> (i32, i32) {
    %c0_i32 = arith.constant 0 : i32
    %c0_i32_0 = arith.constant 0 : i32
    return %c0_i32, %arg1 : i32, i32
  }
  func.func @transform_2(%arg0: i32, %arg1: i32) -> (i32, i32) {
    %c0_i32 = arith.constant 0 : i32
    %c0_i32_0 = arith.constant 0 : i32
    return %c0_i32, %arg1 : i32, i32
  }
  func.func @transform_3(%arg0: i32, %arg1: i32) -> (i32, i32) {
    %c0_i32 = arith.constant 0 : i32
    %c0_i32_0 = arith.constant 0 : i32
    return %c0_i32, %arg1 : i32, i32
  }
  func.func @transform_4(%arg0: i32, %arg1: i32) -> (i32, i32) {
    %c0_i32 = arith.constant 0 : i32
    %c0_i32_0 = arith.constant 0 : i32
    %c0_i32_1 = arith.constant 0 : i32
    return %c0_i32, %c0_i32_0 : i32, i32
  }
  func.func @transform_5(%arg0: i32, %arg1: i32) -> (i32, i32) {
    %c0_i32 = arith.constant 0 : i32
    %c0_i32_0 = arith.constant 0 : i32
    return %arg0, %c0_i32 : i32, i32
  }
}

</mosaic_0001>

<bundles_post_ra>
// kernel: tpu_custom_call.1
= control target key start
LH: loop header
LB: loop body
LE: loop exit
PB: predicated region body
PF: predicated region fallthrough
CT: control target
= control target key end

     0   :  { %11 = vsyncpa [#allocation5], 0  ;;  %s287_s0 = inlined_call_operand.hbm [shape: f32[8,16], index: 0, kind: input, shape index: {}]   ;;  %s288_s1 = inlined_call_operand.hbm [shape: bf16[16,32], index: 1, kind: input, shape index: {}]   ;;  %s289_s2 = inlined_call_operand.vmem [shape: f32[1,32], index: 2, kind: input, shape index: {}]   ;;  %s290_s3 = inlined_call_operand.vmem [shape: f32[1,32], index: 3, kind: input, shape index: {}]   ;;  %s291_s4 = inlined_call_operand.<no memory space> [shape: f32[1,1], index: 4, kind: input, shape index: {}]   ;;  %s292_s5 = inlined_call_operand.vmem [shape: f32[8,1], index: 5, kind: output, shape index: {}]  }
   0x1   :  { %12 = vsyncpa [#allocation7], 0  ;;  %s230_s18 = smov [#allocation4]   ;;  %s231_s20 = smov [#allocation6]  }
   0x2   :  { %s19_s19 = sshll.u32 %s230_s18, 4  ;;  %s28_s21 = sshll.u32 %s231_s20, 4  ;;  %s20_s19 = int_to_ptr.vmem [resolvable:$true] %s19_s19  ;;  %s29_s21 = int_to_ptr.vmem [resolvable:$true] %s28_s21 }
   0x3   :  { %s194_s22 = scalar_lea.vmem %s20_s19, 128  ;;  %p199_p1 = scmp.lt.s32.totalorder %s20_s19, %s20_s19 }
   0x4   :  { %p195_p0 = scmp.ne.s32.totalorder %s20_s19, %s194_s22  ;;  %p200_p2 = scmp.lt.s32.totalorder %s194_s22, %s194_s22 }
   0x6   :  { %p201_p3 = por %p200_p2, %p199_p1 }
   0x8   :  { %p202_p4 = pnand %p201_p3, %p195_p0 }
   0xa   :  { %205 = shalt.err (!%p202_p4)
}
   0xb   :  { %22 = dma.hbm_to_vmem [thread:$0]  %s287_s0, 128, %s20_s19, [#allocation5]  }
   0xc   :  { %s214_s25 = scalar_lea.vmem %s29_s21, 128  ;;  %p219_p6 = scmp.lt.s32.totalorder %s29_s21, %s29_s21 }
   0xd   :  { %p215_p5 = scmp.ne.s32.totalorder %s29_s21, %s214_s25  ;;  %p220_p7 = scmp.lt.s32.totalorder %s214_s25, %s214_s25 }
   0xf   :  { %p221_p8 = por %p220_p7, %p219_p6 }
  0x11   :  { %p222_p9 = pnand %p221_p8, %p215_p5 }
  0x13   :  { %225 = shalt.err (!%p222_p9)
}
  0x14   :  { %s232_s26 = smov 64   ;;  %s233_s27 = smov 4  }
  0x15   :  { %34 = dma.hbm_to_vmem [thread:$0]  %s288_s1, 128, %s29_s21, [#allocation7], %s232_s26, %s232_s26, %s233_s27  }
  0x16   :  { %226 = dma.done.wait [#allocation5], 128  }
  0x17   :  { %227 = vsyncadd [#allocation5], 4294967168 }
  0x18   :  { %228 = dma.done.wait [#allocation7], 128  }
  0x19   :  { %229 = vsyncadd [#allocation7], 4294967168  ;;  %vm52_vm0 = vcmask 7168   ;;  %v234_v0 = vmov 0.0   ;;  %vm235_vm1 = vmmov 0   ;;  %v177_v1 = vld [vmem:[#allocation6] sm:$0xff]   ;;  %v142_v20 = vstv %s291_s4 }
  0x1a   :  { %53 = vst.msk [vmem:[#allocation2] sm:$0xff] %vm52_vm0, %v234_v0  ;;  %165 = vmatprep.subr.bf16.mxu0 %v234_v0  ;;  %167 = vmatprep.mubr.msk.bf16.mxu0 %vm235_vm1, %v234_v0  ;;  %v54_v2 = vld [vmem:[#allocation4] sm:$0xff]  ;;  %vm71_vm2 = vcmask 130048   ;;  %v157_v4 = vld [vmem:[%s289_s2] ss:$0 sm:$0xff]  ;;  %vm130_vm3 = vcmask 261120  }
  0x1b   :  { %166 = vmatpush3.bf16.msra.mxu0 %v177_v1  ;;  %v55_v3 = vpack.c.bf16 %v54_v2, %v54_v2  ;;  %v161_v13 = vld [vmem:[%s290_s3] ss:$0 sm:$0xff] }
  0x1e   :  { %168 = vmatmul.mubr.msk.bf16.vlgmr.msra.gmra.mxu0 %vm71_vm2, %v55_v3 }
  0x21   :  { %v121_v17 = vld [vmem:[#allocation2] sm:$0xff] }
  0xde   :  { %v109_v5 = vpop.f32.mrf.mxu0 }
  0xdf   :  { %v110_v6 = vadd.f32 %v157_v4, %v109_v5 }
  0xe0   :  { %v169_v7 = vpop.f32.mrf.mxu0 }
  0xe1   :  { %v160_v8 = vmul.f32 -1.442695, %v110_v6 }
  0xe2   :  { %v112_v9 = vpop.f32.mrf.mxu0 }
  0xe3   :  { %178 = vpow2.f32 %v160_v8 }
  0xe4   :  { %v170_v10 = vpop.f32.mrf.mxu0 }
  0xf0   :  { %v179_v11 = vpop.eup %178 }
  0xf1   :  { %v118_v12 = vadd.f32 1.0, %v179_v11 }
  0xf3   :  { %180 = vrcp.f32 %v118_v12 }
 0x100   :  { %v181_v14 = vpop.eup %180 }
 0x101   :  { %v129_v15 = vmul.f32 %v181_v14, %v161_v13 }
 0x103   :  { %v131_v16 = vsel %vm130_vm3, %v129_v15, 0.0 }
 0x104   :  { %132 = vadd.xlane.f32.xlu0 %v131_v16 }
 0x18d   :  { %v133_v18 = vpop.xlane.xlu0 %132 }
 0x18e   :  { %v134_v19 = vadd.f32 %v133_v18, %v121_v17 }
 0x190   :  { %136 = vst.msk [vmem:[#allocation2] sm:$0xff] %vm52_vm0, %v134_v19 }
 0x197   :  { %v140_v21 = vld [vmem:[#allocation2] sm:$0xff] }
 0x198   :  { %v143_v22 = vadd.f32 %v142_v20, %v140_v21 }
 0x19a   :  { %v162_v23 = vmul.f32 -1.442695, %v143_v22 }
 0x19c   :  { %182 = vpow2.f32 %v162_v23 }
 0x1a9   :  { %v183_v24 = vpop.eup %182 }
 0x1aa   :  { %v147_v25 = vadd.f32 1.0, %v183_v24 }
 0x1ac   :  { %184 = vrcp.f32 %v147_v25 }
 0x1b9   :  { %v185_v26 = vpop.eup %184 }
 0x1ba   :  { %150 = vst.msk [vmem:[%s292_s5] sm:$0xff] %vm52_vm0, %v185_v26 }
 0x1bb   :  { %155 = vsyncpa [#allocation5], 1 }
 0x1bc   :  { %156 = vsyncpa [#allocation7], 1 }

</bundles_post_ra>
